<compile_context>
chip_gen: v6e
topology: v6e:2x2x1
jax: 0.10.0
libtpu: 0.0.40
codegen_flags: <defaults>
</compile_context>

<pallas_src>
import functools
import math

import jax
import jax.numpy as jnp
from jax.experimental import pallas as pl
from jax.experimental.pallas import tpu as pltpu


def _round_up(x, m):
    return ((x + m - 1) // m) * m


def _tpu_generation():
    """Best-effort TPU generation detection (5 / 6 / 7)."""
    try:
        kind = jax.devices()[0].device_kind.lower()
    except Exception:
        return 6
    for g in (7, 6, 5):
        if f"v{g}" in kind:
            return g
    return 6


def _lsa_kernel(pq_ref, pm_ref, mem_ref, aw_ref, bias_ref, wcd_ref, v_ref,
                ctx_ref, att_ref, *, K, use_bf16_tanh):
    # pq_ref   (Bb, 1, Ap)    f32   hoisted query projection
    # pm_ref   (Bb, Tp, Ap)   bf16  processed memory
    # mem_ref  (Bb, Tp, Mp)   bf16  memory
    # aw_ref   (Bb, Taw, 2)   f32   'same'-padded [prev, cum] alignments
    # bias_ref (Bb, 1, Tp)    f32   0 / -1e30 additive logits mask (T-padding + user masks)
    # wcd_ref  (2K, Ap)       f32   fused location_conv @ location_dense weight
    # v_ref    (1, Ap)        f32   v as a lane-dense row
    # ctx_ref  (Bb, 1, Mp) f32,  att_ref (Bb, 1, Tp) f32
    f32 = jnp.float32
    Bb, Tp, Ap = pm_ref.shape

    # --- in-VMEM im2col of the padded alignments (no Kx-inflated HBM tensor) ---
    aw = aw_ref[...]                                          # (Bb, Taw, 2) f32, tiny
    cols = [aw[:, k:k + Tp, :] for k in range(K)]             # K static sublane-offset slices
    aw2k = jnp.concatenate(cols, axis=-1)                     # (Bb, Tp, 2K), col = k*2 + c

    # --- fused location conv + dense: one (Bb*Tp, 2K) @ (2K, Ap) MXU matmul ---
    loc = jnp.dot(aw2k.reshape(Bb * Tp, 2 * K), wcd_ref[...],
                  preferred_element_type=f32).reshape(Bb, Tp, Ap)

    # --- additive energies: tanh(pq + loc + pm) ---
    pre = pq_ref[...] + loc + pm_ref[...].astype(f32)         # (Bb, Tp, Ap) f32
    if use_bf16_tanh:                                         # v6e/v7x: bf16 EUP path
        e = jnp.tanh(pre.astype(jnp.bfloat16)).astype(f32)
    else:                                                     # v5e: no bf16 EUP
        e = jnp.tanh(pre)

    # --- project onto v: VPU multiply against broadcast v-row + lane reduce over Ap ---
    # TODO(synk): if a bundle dump shows the XLU reduce+relayout binding, move this to an
    # MXU (Bb*Tp, Ap) @ (Ap, 1) matmul (the MXU has slack here).
    logits = jnp.sum(e * v_ref[...][None, :, :], axis=-1)     # (Bb, Tp), T on lanes
    logits = logits + bias_ref[...][:, 0, :]                  # mask padded / user-masked t

    # --- softmax over time (lane axis), f32.  (reference's +1e-5 is shift-invariant) ---
    m = jnp.max(logits, axis=-1, keepdims=True)
    w = jnp.exp(logits - m)
    attw = w * pl.reciprocal(jnp.sum(w, axis=-1, keepdims=True), approx=True)  # (Bb, Tp)

    # --- context: MXU contraction over T per batch, bf16 operands / f32 accum ---
    attw3 = attw[:, None, :]                                  # (Bb, 1, Tp)
    ctx = jnp.einsum("bqt,btm->bqm", attw3.astype(mem_ref.dtype), mem_ref[...],
                     preferred_element_type=f32)              # (Bb, 1, Mp)

    ctx_ref[...] = ctx.astype(ctx_ref.dtype)
    att_ref[...] = attw3.astype(att_ref.dtype)


def _pick_batch_block(B, Tp, Ap, Mp, K, Taw, gen):
    """Batch-block size, generation-aware.

    v5e/v6e (1 TC): maximize Bb within a large VMEM budget (per-step overhead dominates).
    v7x (2 TCs, 64 MiB VMEM): smaller budget, keep the grid an exact multiple of 2.
    The footprint counts double-buffered pipelined I/O *and* the in-kernel f32 temps.
    """
    # double-buffered pipelined inputs/outputs (x2 buffers each)
    io = 2 * (2 * Tp * Ap       # processed_memory (bf16)
              + 2 * Tp * Mp     # memory (bf16)
              + 4 * Taw * 2     # padded alignments (f32, tiny)
              + 4 * Ap          # pq (f32)
              + 4 * Tp          # bias (f32)
              + 4 * Mp          # ctx out (f32)
              + 4 * Tp)         # attw out (f32)
    # single-buffered in-kernel intermediates: aw2k f32, loc/pre/e f32, bf16 temps, softmax rows
    interm = Tp * (4 * 2 * K + 12 * Ap + 2 * Ap) + 64 * Tp
    per_b = max(1, io + interm)

    budget = (32 << 20) if gen >= 7 else (64 << 20)
    bb = max(1, min(B, budget // per_b))

    if gen >= 7 and B >= 2:
        bb = min(bb, max(1, B // 2))          # keep >= 2 grid steps for the 2 TCs
    while B % bb:
        bb -= 1
    if gen >= 7 and B >= 2:
        # prefer an even number of grid steps so both TensorCores stay busy
        while bb > 1 and (B // bb) % 2:
            bb -= 1
            while B % bb:
                bb -= 1
    return bb


def location_sensitive_attention(attention_hidden_state, memory, processed_memory,
                                 previous_alignments, cumulated_alignments, params,
                                 masks=None):
    """Forward pass of Location_Sensitive_Attention (masks supported via additive -1e30 bias)."""
    B, T, M = memory.shape
    A = processed_memory.shape[2]
    wq, wconv, wd, wv = params["wq"], params["wconv"], params["wd"], params["v"]
    K = wconv.shape[0]
    pad = (K - 1) // 2            # symmetric 'same' padding (odd K, as asserted in ConvNorm)

    gen = _tpu_generation()
    use_bf16_tanh = gen >= 6
    bf16, f32 = jnp.bfloat16, jnp.float32

    Tp = _round_up(T, 8)
    Ap = _round_up(A, 128)
    Mp = _round_up(M, 128)
    Taw = _round_up(Tp + K - 1, 8)

    # --- wrapper-side glue (tiny, plain XLA; pads fuse into the dtype converts) ---
    # hoisted query projection: one batched matmul instead of a per-step (1,Rq)x(Rq,A)
    pq = attention_hidden_state.astype(f32) @ wq.astype(f32)                     # (B, A)
    pq = jnp.pad(pq, ((0, 0), (0, Ap - A))).reshape(B, 1, Ap)

    pm_b = jnp.pad(processed_memory, ((0, 0), (0, Tp - T), (0, Ap - A))).astype(bf16)
    mem_b = jnp.pad(memory, ((0, 0), (0, Tp - T), (0, Mp - M))).astype(bf16)

    # padded [prev, cum] alignments for the in-kernel im2col ('same' conv padding)
    aw_cat = jnp.stack([previous_alignments, cumulated_alignments], axis=-1)     # (B, T, 2)
    aw_pad = jnp.pad(aw_cat, ((0, 0), (pad, Taw - T - pad), (0, 0))).astype(f32)  # (B, Taw, 2)

    # fuse location_conv (no bias) with location_dense (no bias): Wcd[k*2+c, a]
    wcd = wconv.reshape(K * 2, -1).astype(f32) @ wd.astype(f32)                  # (2K, A)
    wcd = jnp.pad(wcd, ((0, 0), (0, Ap - A)))
    v_row = jnp.pad(wv.reshape(1, A).astype(f32), ((0, 0), (0, Ap - A)))         # (1, Ap)

    # additive logits bias: -1e30 at T-padding and user-masked positions
    valid_t = (jnp.arange(Tp) < T)[None, :]                                      # (1, Tp)
    if masks is not None:
        keep = valid_t & jnp.pad(~masks, ((0, 0), (0, Tp - T)))                  # (B, Tp)
    else:
        keep = jnp.broadcast_to(valid_t, (B, Tp))
    bias = jnp.where(keep, 0.0, -1e30).astype(f32).reshape(B, 1, Tp)

    Bb = _pick_batch_block(B, Tp, Ap, Mp, K, Taw, gen)
    grid = (B // Bb,)
    vmem_limit = (48 << 20) if gen >= 7 else (96 << 20)

    kernel = functools.partial(_lsa_kernel, K=K, use_bf16_tanh=use_bf16_tanh)

    ctx, attw = pl.pallas_call(
        kernel,
        out_shape=(
            jax.ShapeDtypeStruct((B, 1, Mp), f32),
            jax.ShapeDtypeStruct((B, 1, Tp), f32),
        ),
        grid_spec=pltpu.PrefetchScalarGridSpec(
            num_scalar_prefetch=0,
            grid=grid,
            in_specs=[
                pl.BlockSpec((Bb, 1, Ap), lambda b: (b, 0, 0)),      # hoisted query proj
                pl.BlockSpec((Bb, Tp, Ap), lambda b: (b, 0, 0)),     # processed_memory (bf16)
                pl.BlockSpec((Bb, Tp, Mp), lambda b: (b, 0, 0)),     # memory (bf16)
                pl.BlockSpec((Bb, Taw, 2), lambda b: (b, 0, 0)),     # padded alignments
                pl.BlockSpec((Bb, 1, Tp), lambda b: (b, 0, 0)),      # softmax mask bias
                pl.BlockSpec((2 * K, Ap), lambda b: (0, 0)),         # fused conv+dense weight
                pl.BlockSpec((1, Ap), lambda b: (0, 0)),             # v row
            ],
            out_specs=(
                pl.BlockSpec((Bb, 1, Mp), lambda b: (b, 0, 0)),      # context (lane-dense M)
                pl.BlockSpec((Bb, 1, Tp), lambda b: (b, 0, 0)),      # attn weights (lane-dense T)
            ),
        ),
        compiler_params=pltpu.CompilerParams(
            dimension_semantics=("parallel",),
            vmem_limit_bytes=vmem_limit,
        ),
    )(pq, pm_b, mem_b, aw_pad, bias, wcd, v_row)

    attention_context = ctx[:, 0, :M].astype(memory.dtype)
    attention_weights = attw[:, 0, :T]
    return attention_context, attention_weights


def init_params(key, Rq, M, A, Fc, K):
    """Deterministic xavier-uniform init mirroring the PyTorch module's __init__ shapes."""
    ks = jax.random.split(key, 5)

    def xavier(k, shape, fan_in, fan_out, gain):
        bound = gain * math.sqrt(6.0 / (fan_in + fan_out))
        return jax.random.uniform(k, shape, jnp.float32, -bound, bound)

    g_tanh = 5.0 / 3.0
    Wq = xavier(ks[0], (A, Rq), Rq, A, g_tanh)             # query_layer.weight
    Wm = xavier(ks[1], (A, M), M, A, g_tanh)               # memory_layer.weight
    Wv = xavier(ks[2], (1, A), A, 1, 1.0)                  # v.weight
    Wconv = xavier(ks[3], (Fc, 2, K), 2 * K, Fc * K, 1.0)  # location_conv.weight
    Wd = xavier(ks[4], (A, Fc), Fc, A, g_tanh)             # location_dense.weight
    return {
        "wq": Wq.T,                                 # (Rq, A)
        "wm": Wm.T,                                 # (M, A)
        "v": Wv.T,                                  # (A, 1)
        "wconv": jnp.transpose(Wconv, (2, 1, 0)),   # (K, 2, Fc)
        "wd": Wd.T,                                 # (Fc, A)
    }


def reference_forward(query, memory, processed_memory, prev, cum, p, masks=None):
    """Plain-JAX f32 reference replicating the PyTorch math, with unfused weights."""
    B, T, _ = memory.shape
    K = p["wconv"].shape[0]
    pad = (K - 1) // 2
    pq = query[:, None, :] @ p["wq"]                                      # (B,1,A)
    aw_tm = jnp.pad(jnp.stack([prev, cum], axis=-1), ((0, 0), (pad, pad), (0, 0)))
    conv = sum(aw_tm[:, k:k + T, :] @ p["wconv"][k] for k in range(K))    # (B,T,F)
    loc = conv @ p["wd"]                                                  # (B,T,A)
    e = jnp.tanh(pq + loc + processed_memory)
    energies = (e @ p["v"])[..., 0]                                       # (B,T)
    if masks is not None:
        energies = jnp.where(masks, -jnp.inf, energies)
    w = jax.nn.softmax(energies + 1e-5, axis=1)
    ctx = jnp.einsum("bt,btm->bm", w, memory)
    return ctx, w


if __name__ == "__main__":
    key = jax.random.PRNGKey(0)
    B, T = 2, 16
    Rq, M, A, Fc, K = 32, 16, 32, 8, 5   # rnn-ch, memory, attn, loc-filters, loc-kernel

    k1, k2, k3, k4, kp = jax.random.split(key, 5)
    attention_hidden_state = jax.random.normal(k1, (B, Rq), jnp.float32)
    memory = jax.random.normal(k2, (B, T, M), jnp.float32)
    previous_alignments = jax.nn.softmax(jax.random.normal(k3, (B, T), jnp.float32), axis=-1)
    cumulated_alignments = jax.nn.softmax(jax.random.normal(k4, (B, T), jnp.float32), axis=-1)

    params = init_params(kp, Rq, M, A, Fc, K)
    # Get_Processed_Memory (memory_layer) — glue, done once in plain JAX
    processed_memory = memory @ params["wm"]

    # --- masks=None path ---
    ctx, attw = location_sensitive_attention(
        attention_hidden_state, memory, processed_memory,
        previous_alignments, cumulated_alignments, params)
    jax.block_until_ready((ctx, attw))

    ctx_ref, attw_ref = reference_forward(
        attention_hidden_state, memory, processed_memory,
        previous_alignments, cumulated_alignments, params)

    assert ctx.shape == (B, M) and attw.shape == (B, T)
    # bf16 inputs for processed_memory / memory -> compare at bf16-level tolerance
    assert jnp.allclose(ctx, ctx_ref, atol=2e-2, rtol=2e-2)
    assert jnp.allclose(attw, attw_ref, atol=2e-2, rtol=2e-2)

    # --- masks path (binary mask for padded encoder steps) ---
    masks = jnp.zeros((B, T), dtype=bool).at[1, T - 5:].set(True)
    ctx_m, attw_m = location_sensitive_attention(
        attention_hidden_state, memory, processed_memory,
        previous_alignments, cumulated_alignments, params, masks=masks)
    jax.block_until_ready((ctx_m, attw_m))
    ctx_mr, attw_mr = reference_forward(
        attention_hidden_state, memory, processed_memory,
        previous_alignments, cumulated_alignments, params, masks=masks)
    assert jnp.allclose(ctx_m, ctx_mr, atol=2e-2, rtol=2e-2)
    assert jnp.allclose(attw_m, attw_mr, atol=2e-2, rtol=2e-2)
    assert jnp.max(attw_m[1, T - 5:]) == 0.0

    print("KERNEL_OK")
</pallas_src>

<mosaic_0001>
module attributes {stable_mosaic.version = 11 : i64} {
  func.func @_lsa_kernel(%arg0: i32, %arg1: memref<2x1x128xf32, #tpu.memory_space<vmem>>, %arg2: memref<2x16x128xbf16, #tpu.memory_space<vmem>>, %arg3: memref<2x16x128xbf16, #tpu.memory_space<vmem>>, %arg4: memref<2x24x2xf32, #tpu.memory_space<vmem>>, %arg5: memref<2x1x16xf32, #tpu.memory_space<vmem>>, %arg6: memref<10x128xf32, #tpu.memory_space<vmem>>, %arg7: memref<1x128xf32, #tpu.memory_space<vmem>>, %arg8: memref<2x1x128xf32, #tpu.memory_space<vmem>>, %arg9: memref<2x1x16xf32, #tpu.memory_space<vmem>>) attributes {dimension_semantics = [#tpu.dimension_semantics<parallel>], iteration_bounds = array<i64: 1>, scalar_prefetch = 0 : i64, scratch_operands = 0 : i64, tpu.core_type = #tpu.core_type<tc>, window_params = [{transform_indices = @transform_0, window_bounds = array<i64: 2, 1, 128>}, {transform_indices = @transform_1, window_bounds = array<i64: 2, 16, 128>}, {transform_indices = @transform_2, window_bounds = array<i64: 2, 16, 128>}, {transform_indices = @transform_3, window_bounds = array<i64: 2, 24, 2>}, {transform_indices = @transform_4, window_bounds = array<i64: 2, 1, 16>}, {pipeline_mode = #tpu.pipeline_mode<synchronous>, transform_indices = @transform_5, window_bounds = array<i64: 10, 128>}, {pipeline_mode = #tpu.pipeline_mode<synchronous>, transform_indices = @transform_6, window_bounds = array<i64: 1, 128>}, {transform_indices = @transform_7, window_bounds = array<i64: 2, 1, 128>}, {transform_indices = @transform_8, window_bounds = array<i64: 2, 1, 16>}]} {
    %c0 = arith.constant 0 : index
    %c0_0 = arith.constant 0 : index
    %c0_1 = arith.constant 0 : index
    %0 = vector.load %arg4[%c0, %c0_0, %c0_1] : memref<2x24x2xf32, #tpu.memory_space<vmem>>, vector<2x24x2xf32>
    %1 = vector.extract_strided_slice %0 {offsets = [0, 0, 0], sizes = [2, 16, 2], strides = [1, 1, 1]} : vector<2x24x2xf32> to vector<2x16x2xf32>
    %2 = vector.extract_strided_slice %0 {offsets = [0, 1, 0], sizes = [2, 16, 2], strides = [1, 1, 1]} : vector<2x24x2xf32> to vector<2x16x2xf32>
    %3 = vector.extract_strided_slice %0 {offsets = [0, 2, 0], sizes = [2, 16, 2], strides = [1, 1, 1]} : vector<2x24x2xf32> to vector<2x16x2xf32>
    %4 = vector.extract_strided_slice %0 {offsets = [0, 3, 0], sizes = [2, 16, 2], strides = [1, 1, 1]} : vector<2x24x2xf32> to vector<2x16x2xf32>
    %5 = vector.extract_strided_slice %0 {offsets = [0, 4, 0], sizes = [2, 16, 2], strides = [1, 1, 1]} : vector<2x24x2xf32> to vector<2x16x2xf32>
    %6 = tpu.concatenate %1, %2, %3, %4, %5 in 2 : vector<2x16x2xf32>, vector<2x16x2xf32>, vector<2x16x2xf32>, vector<2x16x2xf32>, vector<2x16x2xf32> -> vector<2x16x10xf32>
    %7 = vector.shape_cast %6 : vector<2x16x10xf32> to vector<32x10xf32>
    %c0_2 = arith.constant 0 : index
    %c0_3 = arith.constant 0 : index
    %8 = vector.load %arg6[%c0_2, %c0_3] : memref<10x128xf32, #tpu.memory_space<vmem>>, vector<10x128xf32>
    %cst = arith.constant dense<0.000000e+00> : vector<32x128xf32>
    %9 = tpu.matmul %7, %8, %cst {dimension_numbers = #tpu.dot_dimension_numbers<[1], [0], [0], [1], [0, 0, 1, 1], [], []>} : vector<32x10xf32>, vector<10x128xf32>, vector<32x128xf32> -> vector<32x128xf32>
    %10 = vector.shape_cast %9 : vector<32x128xf32> to vector<2x16x128xf32>
    %c0_4 = arith.constant 0 : index
    %c0_5 = arith.constant 0 : index
    %c0_6 = arith.constant 0 : index
    %11 = vector.load %arg1[%c0_4, %c0_5, %c0_6] : memref<2x1x128xf32, #tpu.memory_space<vmem>>, vector<2x1x128xf32>
    %12 = vector.broadcast %11 : vector<2x1x128xf32> to vector<2x16x128xf32>
    %13 = arith.addf %12, %10 : vector<2x16x128xf32>
    %c0_7 = arith.constant 0 : index
    %c0_8 = arith.constant 0 : index
    %c0_9 = arith.constant 0 : index
    %14 = vector.load %arg2[%c0_7, %c0_8, %c0_9] : memref<2x16x128xbf16, #tpu.memory_space<vmem>>, vector<2x16x128xbf16>
    %15 = arith.extf %14 : vector<2x16x128xbf16> to vector<2x16x128xf32>
    %16 = arith.addf %13, %15 : vector<2x16x128xf32>
    %17 = arith.truncf %16 : vector<2x16x128xf32> to vector<2x16x128xbf16>
    %18 = math.tanh %17 : vector<2x16x128xbf16>
    %19 = arith.extf %18 : vector<2x16x128xbf16> to vector<2x16x128xf32>
    %c0_10 = arith.constant 0 : index
    %c0_11 = arith.constant 0 : index
    %20 = vector.load %arg7[%c0_10, %c0_11] : memref<1x128xf32, #tpu.memory_space<vmem>>, vector<1x128xf32>
    %21 = vector.shape_cast %20 : vector<1x128xf32> to vector<1x1x128xf32>
    %22 = vector.broadcast %21 : vector<1x1x128xf32> to vector<2x16x128xf32>
    %23 = arith.mulf %19, %22 : vector<2x16x128xf32>
    %cst_12 = arith.constant dense<0.000000e+00> : vector<2x16xf32>
    %24 = vector.multi_reduction <add>, %23, %cst_12 [2] : vector<2x16x128xf32> to vector<2x16xf32>
    %c0_13 = arith.constant 0 : index
    %c0_14 = arith.constant 0 : index
    %c0_15 = arith.constant 0 : index
    %25 = vector.load %arg5[%c0_13, %c0_14, %c0_15] : memref<2x1x16xf32, #tpu.memory_space<vmem>>, vector<2x1x16xf32>
    %26 = vector.shape_cast %25 : vector<2x1x16xf32> to vector<2x16xf32>
    %27 = arith.addf %24, %26 : vector<2x16xf32>
    %cst_16 = arith.constant dense<0xFF800000> : vector<2xf32>
    %28 = vector.multi_reduction <maximumf>, %27, %cst_16 [1] : vector<2x16xf32> to vector<2xf32>
    %29 = vector.shape_cast %28 : vector<2xf32> to vector<2x1xf32>
    %30 = vector.broadcast %29 : vector<2x1xf32> to vector<2x16xf32>
    %31 = arith.subf %27, %30 : vector<2x16xf32>
    %32 = math.exp %31 : vector<2x16xf32>
    %cst_17 = arith.constant dense<0.000000e+00> : vector<2xf32>
    %33 = vector.multi_reduction <add>, %32, %cst_17 [1] : vector<2x16xf32> to vector<2xf32>
    %34 = vector.shape_cast %33 : vector<2xf32> to vector<2x1xf32>
    %35 = tpu.reciprocal %34 {approx = true} : vector<2x1xf32> -> vector<2x1xf32>
    %36 = vector.broadcast %35 : vector<2x1xf32> to vector<2x16xf32>
    %37 = arith.mulf %32, %36 : vector<2x16xf32>
    %38 = vector.shape_cast %37 : vector<2x16xf32> to vector<2x1x16xf32>
    %39 = arith.truncf %38 : vector<2x1x16xf32> to vector<2x1x16xbf16>
    %c0_18 = arith.constant 0 : index
    %c0_19 = arith.constant 0 : index
    %c0_20 = arith.constant 0 : index
    %40 = vector.load %arg3[%c0_18, %c0_19, %c0_20] : memref<2x16x128xbf16, #tpu.memory_space<vmem>>, vector<2x16x128xbf16>
    "tpu.trace_start"() <{level = 10 : i32, message = "bqt,btm->bqm"}> : () -> ()
    %cst_21 = arith.constant dense<0.000000e+00> : vector<2x1x128xf32>
    %41 = tpu.matmul %39, %40, %cst_21 {dimension_numbers = #tpu.dot_dimension_numbers<[2], [1], [1], [2], [0, 0, 0, 1, 1, 2], [0], [0]>} : vector<2x1x16xbf16>, vector<2x16x128xbf16>, vector<2x1x128xf32> -> vector<2x1x128xf32>
    "tpu.trace_stop"() : () -> ()
    %c0_22 = arith.constant 0 : index
    %c0_23 = arith.constant 0 : index
    %c0_24 = arith.constant 0 : index
    %42 = vector.load %arg8[%c0_22, %c0_23, %c0_24] : memref<2x1x128xf32, #tpu.memory_space<vmem>>, vector<2x1x128xf32>
    tpu.vector_store %arg8[%c0_22, %c0_23, %c0_24], %41 {strides = array<i32>} : memref<2x1x128xf32, #tpu.memory_space<vmem>>, vector<2x1x128xf32>,
    %c0_25 = arith.constant 0 : index
    %c0_26 = arith.constant 0 : index
    %c0_27 = arith.constant 0 : index
    %43 = vector.load %arg9[%c0_25, %c0_26, %c0_27] : memref<2x1x16xf32, #tpu.memory_space<vmem>>, vector<2x1x16xf32>
    tpu.vector_store %arg9[%c0_25, %c0_26, %c0_27], %38 {strides = array<i32>} : memref<2x1x16xf32, #tpu.memory_space<vmem>>, vector<2x1x16xf32>,
    return
  }
  func.func @transform_0(%arg0: i32) -> (i32, i32, i32) {
    %c0_i32 = arith.constant 0 : i32
    %c0_i32_0 = arith.constant 0 : i32
    %c0_i32_1 = arith.constant 0 : i32
    return %arg0, %c0_i32, %c0_i32_0 : i32, i32, i32
  }
  func.func @transform_1(%arg0: i32) -> (i32, i32, i32) {
    %c0_i32 = arith.constant 0 : i32
    %c0_i32_0 = arith.constant 0 : i32
    %c0_i32_1 = arith.constant 0 : i32
    return %arg0, %c0_i32, %c0_i32_0 : i32, i32, i32
  }
  func.func @transform_2(%arg0: i32) -> (i32, i32, i32) {
    %c0_i32 = arith.constant 0 : i32
    %c0_i32_0 = arith.constant 0 : i32
    %c0_i32_1 = arith.constant 0 : i32
    return %arg0, %c0_i32, %c0_i32_0 : i32, i32, i32
  }
  func.func @transform_3(%arg0: i32) -> (i32, i32, i32) {
    %c0_i32 = arith.constant 0 : i32
    %c0_i32_0 = arith.constant 0 : i32
    %c0_i32_1 = arith.constant 0 : i32
    return %arg0, %c0_i32, %c0_i32_0 : i32, i32, i32
  }
  func.func @transform_4(%arg0: i32) -> (i32, i32, i32) {
    %c0_i32 = arith.constant 0 : i32
    %c0_i32_0 = arith.constant 0 : i32
    %c0_i32_1 = arith.constant 0 : i32
    return %arg0, %c0_i32, %c0_i32_0 : i32, i32, i32
  }
  func.func @transform_5(%arg0: i32) -> (i32, i32) {
    %c0_i32 = arith.constant 0 : i32
    %c0_i32_0 = arith.constant 0 : i32
    %c0_i32_1 = arith.constant 0 : i32
    return %c0_i32, %c0_i32_0 : i32, i32
  }
  func.func @transform_6(%arg0: i32) -> (i32, i32) {
    %c0_i32 = arith.constant 0 : i32
    %c0_i32_0 = arith.constant 0 : i32
    %c0_i32_1 = arith.constant 0 : i32
    return %c0_i32, %c0_i32_0 : i32, i32
  }
  func.func @transform_7(%arg0: i32) -> (i32, i32, i32) {
    %c0_i32 = arith.constant 0 : i32
    %c0_i32_0 = arith.constant 0 : i32
    %c0_i32_1 = arith.constant 0 : i32
    return %arg0, %c0_i32, %c0_i32_0 : i32, i32, i32
  }
  func.func @transform_8(%arg0: i32) -> (i32, i32, i32) {
    %c0_i32 = arith.constant 0 : i32
    %c0_i32_0 = arith.constant 0 : i32
    %c0_i32_1 = arith.constant 0 : i32
    return %arg0, %c0_i32, %c0_i32_0 : i32, i32, i32
  }
}

</mosaic_0001>

<bundles_post_ra>
// kernel: tpu_custom_call.1
= control target key start
LH: loop header
LB: loop body
LE: loop exit
PB: predicated region body
PF: predicated region fallthrough
CT: control target
= control target key end

     0   :  { %14 = vsyncpa [#allocation3], 0  ;;  %vm43_vm0 = vcmask 1046528   ;;  %s821_s17 = smov 2   ;;  %vm66_vm1 = vcmask 1045504   ;;  %s1044_s0 = inlined_call_operand.vmem [shape: f32[2,1,128], index: 0, kind: input, shape index: {}]   ;;  %s1045_s1 = inlined_call_operand.vmem [shape: bf16[2,16,128], index: 1, kind: input, shape index: {}]   ;;  %s1046_s2 = inlined_call_operand.vmem [shape: bf16[2,16,128], index: 2, kind: input, shape index: {}]   ;;  %s1047_s3 = inlined_call_operand.vmem [shape: f32[2,24,2], index: 3, kind: input, shape index: {}]   ;;  %s1048_s4 = inlined_call_operand.vmem [shape: f32[2,1,16], index: 4, kind: input, shape index: {}]   ;;  %s1049_s5 = inlined_call_operand.vmem [shape: f32[10,128], index: 5, kind: input, shape index: {}]   ;;  %s1050_s6 = inlined_call_operand.vmem [shape: f32[1,128], index: 6, kind: input, shape index: {}]   ;;  %s1051_s7 = inlined_call_operand.hbm [shape: f32[2,1,128], index: 7, kind: output, shape index: {0}]   ;;  %s1052_s8 = inlined_call_operand.hbm [shape: f32[2,1,16], index: 8, kind: output, shape index: {1}]  }
   0x1   :  { %v880_v0 = vld [vmem:[%s1047_s3 + $0x8] sm:$0xff]  ;;  %v885_v1 = vld [vmem:[%s1047_s3 + $0x10] sm:$0xff]  ;;  %v890_v2 = vld [vmem:[%s1047_s3] sm:$0xff] }
   0x2   :  { %v45_v3 = vrot.slane %v880_v0, 1  ;;  %v47_v4 = vrot.slane %v885_v1, 1  ;;  %v44_v5 = vrot.slane %v890_v2, 1  ;;  %v898_v6 = vld [vmem:[%s1047_s3 + $0x20] sm:$0xff]  ;;  %v903_v7 = vld [vmem:[%s1047_s3 + $0x28] sm:$0xff]  ;;  %v908_v8 = vld [vmem:[%s1047_s3 + $0x18] sm:$0xff] }
   0x3   :  { %v50_v9 = vrot.slane %v898_v6, 1  ;;  %v52_v10 = vrot.slane %v903_v7, 1  ;;  %v49_v11 = vrot.slane %v908_v8, 1  ;;  %v72_v14 = vrot.slane %v908_v8, 2 }
   0x4   :  { %v48_v12 = vsel %vm43_vm0, %v45_v3, %v47_v4  ;;  %v46_v13 = vsel %vm43_vm0, %v44_v5, %v45_v3  ;;  %v73_v15 = vrot.slane %v898_v6, 2  ;;  %v67_v18 = vrot.slane %v890_v2, 2 }
   0x5   :  { %56 = vrot.lane.b32.xlu1 %v48_v12, %s821_s17  ;;  %54 = vrot.lane.b32.xlu0 %v46_v13, %s821_s17  ;;  %v53_v16 = vsel %vm43_vm0, %v50_v9, %v52_v10  ;;  %v51_v17 = vsel %vm43_vm0, %v49_v11, %v50_v9  ;;  %v68_v19 = vrot.slane %v880_v0, 2 }
   0x6   :  { %15 = vsyncpa [#allocation5], 0  ;;  %v75_v20 = vrot.slane %v903_v7, 2  ;;  %v74_v21 = vsel %vm66_vm1, %v72_v14, %v73_v15  ;;  %v70_v23 = vrot.slane %v885_v1, 2  ;;  %s822_s3 = smov 4   ;;  %v95_v25 = vrot.slane %v908_v8, 3 }
   0x7   :  { %v69_v22 = vsel %vm66_vm1, %v67_v18, %v68_v19  ;;  %v96_v27 = vrot.slane %v898_v6, 3  ;;  %v90_v28 = vrot.slane %v890_v2, 3  ;;  %v91_v29 = vrot.slane %v880_v0, 3  ;;  %v156_v30 = vld [vmem:[%s1049_s5 + $0x8] sm:$0x3]  ;;  %v155_v31 = vld [vmem:[%s1049_s5] sm:$0xff] }
   0x8   :  { %v76_v24 = vsel %vm66_vm1, %v73_v15, %v75_v20  ;;  %v71_v26 = vsel %vm66_vm1, %v68_v19, %v70_v23  ;;  %vm89_vm2 = vcmask 1044480   ;;  %vm170_vm3 = vcmask 1041408   ;;  %s823_s22 = smov 6   ;;  %s824_s5 = smov 8   ;;  %v948_v48 = vld [vmem:[%s1048_s4] ss:$0 sm:$0xff] }
   0x9   :  { %60 = vrot.lane.b32.xlu1 %v53_v16, %s821_s17  ;;  %58 = vrot.lane.b32.xlu0 %v51_v17, %s821_s17  ;;  %v97_v32 = vsel %vm89_vm2, %v95_v25, %v96_v27  ;;  %v92_v33 = vsel %vm89_vm2, %v90_v28, %v91_v29  ;;  %v98_v34 = vrot.slane %v903_v7, 3  ;;  %v93_v35 = vrot.slane %v885_v1, 3  ;;  %v711_v18 = vld [vmem:[%s1045_s1 + $0x8] sm:$0xff]   ;;  %v694_v19 = vld [vmem:[%s1044_s0] ss:$0 sm:$0xff] }
   0xa   :  { %722 = vmatprep.subr.msk.mxu0 %vm170_vm3, %v156_v30  ;;  %744 = vmatprep.subr.msk.mxu1 %vm170_vm3, %v156_v30  ;;  %v118_v36 = vrot.slane %v908_v8, 4  ;;  %v119_v37 = vrot.slane %v898_v6, 4  ;;  %v113_v40 = vrot.slane %v890_v2, 4  ;;  %v114_v41 = vrot.slane %v880_v0, 4  ;;  %v695_v20 = vld [vmem:[%s1044_s0 + $0x1] ss:$0 sm:$0xff] }
   0xb   :  { %723 = vmatpush3.msk.msra.mxu0 %vm170_vm3, %v156_v30  ;;  %746 = vmatpush3.msk.msra.mxu1 %vm170_vm3, %v156_v30  ;;  %v99_v38 = vsel %vm89_vm2, %v96_v27, %v98_v34  ;;  %v94_v39 = vsel %vm89_vm2, %v91_v29, %v93_v35  ;;  %vm112_vm4 = vcmask 1043456   ;;  %v121_v44 = vrot.slane %v903_v7, 4 }
   0xc   :  { %724 = vmatprep.subr.mxu0 %v155_v31  ;;  %745 = vmatprep.subr.mxu1 %v155_v31  ;;  %v120_v42 = vsel %vm112_vm4, %v118_v36, %v119_v37  ;;  %v115_v43 = vsel %vm112_vm4, %v113_v40, %v114_v41  ;;  %v116_v45 = vrot.slane %v885_v1, 4  ;;  %vm135_vm5 = vcmask 15360   ;;  %v696_v40 = vld [vmem:[%s1050_s6] ss:$0 sm:$0xff] }
   0xd   :  { %81 = vrot.lane.b32.xlu1 %v74_v21, %s822_s3  ;;  %77 = vrot.lane.b32.xlu0 %v69_v22, %s822_s3  ;;  %v122_v46 = vsel %vm112_vm4, %v119_v37, %v121_v44  ;;  %vm140_vm6 = vcmask 31744   ;;  %vm145_vm7 = vcmask 48128   ;;  %vm150_vm8 = vcmask 64512  }
   0xe   :  { %725 = vmatpush3.msra.mxu0 %v155_v31  ;;  %747 = vmatpush3.msra.mxu1 %v155_v31  ;;  %v117_v47 = vsel %vm112_vm4, %v114_v41, %v116_v45  ;;  %vm157_vm9 = vcmask 80896   ;;  %v709_v28 = vunpack.c.l.bf16 %v711_v18  ;;  %vm377_vm10 = vcmask 130112  }
   0xf   :  { %vm388_vm11 = vcmask 1041409   ;;  %vm391_vm12 = vcmask 123904   ;;  %vm827_vm13 = vmmov 0   ;;  %vm504_vm14 = vcmask 130048  }
  0x10   :  { %vm654_vm15 = vcmask 122880  }
  0x11   :  { %83 = vrot.lane.b32.xlu1 %v76_v24, %s822_s3  ;;  %79 = vrot.lane.b32.xlu0 %v71_v26, %s822_s3  ;;  %v710_v24 = vunpack.c.h.bf16 %v711_v18 }
  0x15   :  { %104 = vrot.lane.b32.xlu1 %v97_v32, %s823_s22  ;;  %100 = vrot.lane.b32.xlu0 %v92_v33, %s823_s22 }
  0x19   :  { %106 = vrot.lane.b32.xlu1 %v99_v38, %s823_s22  ;;  %102 = vrot.lane.b32.xlu0 %v94_v39, %s823_s22 }
  0x1d   :  { %127 = vrot.lane.b32.xlu1 %v120_v42, %s824_s5  ;;  %123 = vrot.lane.b32.xlu0 %v115_v43, %s824_s5 }
  0x21   :  { %129 = vrot.lane.b32.xlu1 %v122_v46, %s824_s5  ;;  %125 = vrot.lane.b32.xlu0 %v117_v47, %s824_s5 }
  0x25   :  { %329 = vbcast.lane.b32.xlu1 %v948_v48, 256 }
  0x77   :  { %v57_v49 = vpop.permute.xlu1 %56  ;;  %v55_v50 = vpop.permute.xlu0 %54 }
  0x78   :  { %v136_v61 = vsel %vm135_vm5, %v890_v2, %v55_v50  ;;  %v137_v2 = vsel %vm135_vm5, %v880_v0, %v57_v49 }
  0x7b   :  { %v61_v51 = vpop.permute.xlu1 %60  ;;  %v59_v52 = vpop.permute.xlu0 %58 }
  0x7c   :  { %v138_v62 = vsel %vm135_vm5, %v908_v8, %v59_v52  ;;  %v139_v8 = vsel %vm135_vm5, %v898_v6, %v61_v51  ;;  %v704_v6 = vld [vmem:[%s1045_s1] sm:$0xff]   ;;  %v825_v51 = vmov 0  }
  0x7d   :  { %v706_v22 = vunpack.c.h.bf16 %v704_v6  ;;  %v705_v27 = vunpack.c.l.bf16 %v704_v6  ;;  %759 = vset.pattern.permute.xlu0 %v825_v51  ;;  %760 = vset.pattern.permute.xlu1 %v825_v51  ;;  %v698_v52 = vld [vmem:[%s1048_s4 + $0x1] ss:$0 sm:$0xff] }
  0x7f   :  { %v82_v53 = vpop.permute.xlu1 %81  ;;  %v78_v54 = vpop.permute.xlu0 %77 }
  0x80   :  { %v143_v63 = vsel %vm140_vm6, %v138_v62, %v82_v53  ;;  %v141_v1 = vsel %vm140_vm6, %v136_v61, %v78_v54 }
  0x83   :  { %v84_v55 = vpop.permute.xlu1 %83  ;;  %v80_v56 = vpop.permute.xlu0 %79 }
  0x84   :  { %v144_v11 = vsel %vm140_vm6, %v139_v8, %v84_v55  ;;  %v142_v12 = vsel %vm140_vm6, %v137_v2, %v80_v56 }
  0x87   :  { %v105_v57 = vpop.permute.xlu1 %104  ;;  %v101_v58 = vpop.permute.xlu0 %100 }
  0x88   :  { %v148_v3 = vsel %vm145_vm7, %v143_v63, %v105_v57  ;;  %v146_v4 = vsel %vm145_vm7, %v141_v1, %v101_v58 }
  0x8b   :  { %v107_v59 = vpop.permute.xlu1 %106  ;;  %v103_v60 = vpop.permute.xlu0 %102 }
  0x8c   :  { %v149_v13 = vsel %vm145_vm7, %v144_v11, %v107_v59  ;;  %v147_v14 = vsel %vm145_vm7, %v142_v12, %v103_v60 }
  0x8f   :  { %v128_v5 = vpop.permute.xlu1 %127  ;;  %v124_v7 = vpop.permute.xlu0 %123 }
  0x90   :  { %v151_v9 = vsel %vm150_vm8, %v146_v4, %v124_v7  ;;  %v153_v10 = vsel %vm150_vm8, %v148_v3, %v128_v5  ;;  %v366_v3 = vlaneseq }
  0x91   :  { %726 = vmatprep.mubr.msk.f32.mxu0 %vm157_vm9, %v151_v9  ;;  %729 = vmatprep.mubr.msk.f32.mxu1 %vm157_vm9, %v153_v10 }
  0x92   :  { %v367_v4 = vand.u32 127, %v366_v3  ;;  %v994_v5 = vshrl.u32 %v366_v3, 7 }
  0x93   :  { %v130_v15 = vpop.permute.xlu1 %129  ;;  %v126_v16 = vpop.permute.xlu0 %125 }
  0x94   :  { %v154_v17 = vsel %vm150_vm8, %v149_v13, %v130_v15  ;;  %v152_v0 = vsel %vm150_vm8, %v147_v14, %v126_v16  ;;  %v997_v10 = vsub.s32 %v367_v4, %v994_v5  ;;  %v398_v18 = vsub.s32 0, %v994_v5 }
  0x95   :  { %727 = vmatmul.mubr.msk.f32.vlgmr.msra.gmra.mxu0 %vm157_vm9, %v152_v0  ;;  %730 = vmatmul.mubr.msk.f32.vlgmr.msra.gmra.mxu1 %vm157_vm9, %v154_v17 }
  0x97   :  { %v330_v53 = vpop.permute.xlu1 %329 }
 0x155   :  { %v728_v21 = vpop.f32.mrf.mxu0  ;;  %v731_v23 = vpop.f32.mrf.mxu1 }
 0x156   :  { %v274_v25 = vadd.f32 %v728_v21, %v694_v19  ;;  %v276_v26 = vadd.f32 %v731_v23, %v695_v20 }
 0x157   :  { %v240_v29 = vpop.f32.mrf.mxu0  ;;  %v250_v30 = vpop.f32.mrf.mxu1 }
 0x158   :  { %v273_v31 = vadd.f32 %v694_v19, %v240_v29  ;;  %v275_v32 = vadd.f32 %v695_v20, %v250_v30  ;;  %v286_v33 = vadd.f32 %v706_v22, %v274_v25  ;;  %v288_v34 = vadd.f32 %v710_v24, %v276_v26 }
 0x159   :  { %v402_v19 = vsub.s32 1, %v994_v5 }
 0x15a   :  { %v285_v35 = vadd.f32 %v705_v27, %v273_v31  ;;  %v287_v36 = vadd.f32 %v709_v28, %v275_v32 }
 0x15c   :  { %v289_v37 = vpack.c.bf16 %v286_v33, %v285_v35  ;;  %v290_v38 = vpack.c.bf16 %v288_v34, %v287_v36 }
 0x15e   :  { %763 = vtanh.bf16 %v289_v37 }
 0x15f   :  { %765 = vtanh.bf16 %v290_v38 }
 0x16c   :  { %v764_v39 = vpop.eup %763 }
 0x16d   :  { %v766_v41 = vpop.eup %765  ;;  %v294_v42 = vunpack.c.h.bf16 %v764_v39  ;;  %v293_v43 = vunpack.c.l.bf16 %v764_v39 }
 0x16e   :  { %v295_v46 = vunpack.c.l.bf16 %v766_v41  ;;  %v296_v49 = vunpack.c.h.bf16 %v766_v41 }
 0x16f   :  { %v305_v44 = vmul.f32 %v696_v40, %v294_v42  ;;  %v304_v45 = vmul.f32 %v696_v40, %v293_v43 }
 0x170   :  { %v306_v47 = vmul.f32 %v696_v40, %v295_v46  ;;  %v307_v50 = vmul.f32 %v696_v40, %v296_v49 }
 0x171   :  { %310 = vadd.xlane.f32.xlu1 %v305_v44  ;;  %308 = vadd.xlane.f32.xlu0 %v304_v45 }
 0x175   :  { %312 = vadd.xlane.f32.xlu0 %v306_v47 }
 0x179   :  { %314 = vadd.xlane.f32.xlu0 %v307_v50 }
 0x182   :  { %336 = vbcast.lane.b32.xlu1 %v698_v52, 256 }
 0x186   :  { %340 = vbcast.lane.b32.xlu1 %v698_v52, 264 }
 0x18f   :  { %333 = vbcast.lane.b32.xlu0 %v948_v48, 264  ;;  %v372_v48 = vadd.s32 4294967288, %v367_v4 }
 0x191   :  { %v1000_v2 = vsub.s32 %v372_v48, %v994_v5 }
 0x1fa   :  { %v311_v54 = vpop.xlane.xlu1 %310  ;;  %v309_v55 = vpop.xlane.xlu0 %308 }
 0x1fb   :  { %v346_v56 = vadd.f32 %v330_v53, %v309_v55 }
 0x1fd   :  { %355 = vperm.xlu0 %759, %v346_v56  }
 0x1fe   :  { %v337_v57 = vpop.permute.xlu1 %336  ;;  %v313_v58 = vpop.xlane.xlu0 %312 }
 0x1ff   :  { %v348_v1 = vadd.f32 %v337_v57, %v313_v58 }
 0x202   :  { %v341_v59 = vpop.permute.xlu1 %340  ;;  %v315_v60 = vpop.xlane.xlu0 %314 }
 0x203   :  { %v349_v61 = vadd.f32 %v341_v59, %v315_v60  ;;  %v761_v60 = vld [vmem:[%s1046_s2] sm:$0xff]  }
 0x205   :  { %364 = vperm.xlu0 %759, %v349_v61  }
 0x206   :  { %v334_v62 = vpop.permute.xlu0 %333 }
 0x207   :  { %v347_v63 = vadd.f32 %v334_v62, %v311_v54 }
 0x209   :  { %358 = vperm.xlu1 %760, %v347_v63  }
 0x20d   :  { %361 = vperm.xlu1 %760, %v348_v1  }
 0x278   :  { %v356_v7 = vpop.permute.xlu0 %355 }
 0x279   :  { %v371_v13 = vrot.slane %v356_v7, %v997_v10 }
 0x280   :  { %v365_v8 = vpop.permute.xlu0 %364 }
 0x281   :  { %v386_v14 = vrot.slane %v365_v8, %v1000_v2 }
 0x284   :  { %v359_v9 = vpop.permute.xlu1 %358 }
 0x285   :  { %v376_v11 = vrot.slane %v359_v9, %v1000_v2 }
 0x287   :  { %v378_v16 = vsel %vm377_vm10, %v376_v11, %v371_v13 }
 0x288   :  { %v362_v12 = vpop.permute.xlu1 %361 }
 0x289   :  { %v382_v15 = vrot.slane %v362_v12, %v997_v10 }
 0x28b   :  { %v387_v17 = vsel %vm377_vm10, %v386_v14, %v382_v15 }
 0x28c   :  { %v389_v0 = vsel %vm388_vm11, %v387_v17, %v378_v16 }
 0x28d   :  { %v392_v6 = vsel %vm391_vm12, %v389_v0, -inf }
 0x28e   :  { %393 = vmax.xlane.f32.xlu1 %v392_v6 }
 0x317   :  { %v394_v20 = vpop.xlane.xlu1 %393 }
 0x318   :  { %v399_v21 = vrot.slane %v394_v20, %v398_v18  ;;  %v403_v22 = vrot.slane %v394_v20, %v402_v19 }
 0x31a   :  { %v406_v23 = vsub.f32 %v346_v56, %v399_v21  ;;  %v407_v24 = vsub.f32 %v347_v63, %v399_v21  ;;  %v408_v26 = vsub.f32 %v348_v1, %v403_v22  ;;  %v409_v28 = vsub.f32 %v349_v61, %v403_v22  ;;  %v762_v1 = vld [vmem:[%s1046_s2 + $0x8] sm:$0xff]   ;;  %s828_s2 = smov [#allocation4]  }
 0x31b   :  { %v826_v61 = vmov 0.0   ;;  %s674_s15 = sshll.u32 %s828_s2, 4  ;;  %s675_s15 = int_to_ptr.vmem [resolvable:$true] %s674_s15 }
 0x31c   :  { %v410_v25 = vmul.f32 1.442695, %v406_v23  ;;  %v412_v27 = vmul.f32 1.442695, %v407_v24  ;;  %v414_v29 = vmul.f32 1.442695, %v408_v26  ;;  %732 = vmatprep.subr.bf16.mxu1 %v826_v61  ;;  %734 = vmatprep.mubr.msk.bf16.mxu1 %vm827_vm13, %v826_v61  ;;  %p782_p1 = scmp.lt.s32.totalorder %s675_s15, %s675_s15 }
 0x31d   :  { %v416_v30 = vmul.f32 1.442695, %v409_v28  ;;  %733 = vmatpush3.bf16.msra.mxu1 %v761_v60  ;;  %738 = vmatprep.subr.bf16.mxu0 %v826_v61  ;;  %s777_s16 = scalar_lea.vmem %s675_s15, 32 }
 0x31e   :  { %767 = vpow2.f32 %v410_v25  ;;  %740 = vmatprep.mubr.msk.bf16.mxu0 %vm827_vm13, %v826_v61  ;;  %739 = vmatpush3.bf16.msra.mxu0 %v762_v1  ;;  %p778_p0 = scmp.ne.s32.totalorder %s675_s15, %s777_s16  ;;  %p783_p2 = scmp.lt.s32.totalorder %s777_s16, %s777_s16 }
 0x31f   :  { %769 = vpow2.f32 %v412_v27 }
 0x320   :  { %771 = vpow2.f32 %v414_v29  ;;  %p784_p3 = por %p783_p2, %p782_p1 }
 0x321   :  { %773 = vpow2.f32 %v416_v30 }
 0x322   :  { %p785_p4 = pnand %p784_p3, %p778_p0 }
 0x32b   :  { %v768_v31 = vpop.eup %767 }
 0x32c   :  { %423 = vperm.xlu0 %759, %v768_v31   ;;  %v770_v32 = vpop.eup %769 }
 0x32d   :  { %v772_v33 = vpop.eup %771 }
 0x32e   :  { %v774_v34 = vpop.eup %773 }
 0x330   :  { %426 = vperm.xlu0 %759, %v770_v32  }
 0x334   :  { %429 = vperm.xlu0 %759, %v772_v33  }
 0x338   :  { %432 = vperm.xlu0 %759, %v774_v34  }
 0x3a7   :  { %v424_v35 = vpop.permute.xlu0 %423 }
 0x3a8   :  { %v437_v40 = vrot.slane %v424_v35, %v997_v10 }
 0x3ab   :  { %v427_v36 = vpop.permute.xlu0 %426 }
 0x3ac   :  { %v441_v38 = vrot.slane %v427_v36, %v1000_v2 }
 0x3ae   :  { %v442_v43 = vsel %vm377_vm10, %v441_v38, %v437_v40 }
 0x3af   :  { %v430_v37 = vpop.permute.xlu0 %429 }
 0x3b0   :  { %v446_v41 = vrot.slane %v430_v37, %v997_v10 }
 0x3b3   :  { %v433_v39 = vpop.permute.xlu0 %432 }
 0x3b4   :  { %v450_v42 = vrot.slane %v433_v39, %v1000_v2 }
 0x3b6   :  { %v451_v44 = vsel %vm377_vm10, %v450_v42, %v446_v41 }
 0x3b7   :  { %v452_v45 = vsel %vm388_vm11, %v451_v44, %v442_v43 }
 0x3b8   :  { %v454_v46 = vsel %vm391_vm12, %v452_v45, 0.0 }
 0x3b9   :  { %455 = vadd.xlane.f32.xlu0 %v454_v46 }
 0x442   :  { %v456_v47 = vpop.xlane.xlu0 %455 }
 0x443   :  { %775 = vrcp.f32 %v456_v47 }
 0x450   :  { %v776_v49 = vpop.eup %775 }
 0x451   :  { %v462_v50 = vrot.slane %v776_v49, %v398_v18  ;;  %v466_v51 = vrot.slane %v776_v49, %v402_v19 }
 0x453   :  { %v469_v52 = vmul.f32 %v768_v31, %v462_v50  ;;  %v470_v53 = vmul.f32 %v770_v32, %v462_v50  ;;  %v472_v54 = vmul.f32 %v774_v34, %v466_v51  ;;  %v471_v55 = vmul.f32 %v772_v33, %v466_v51 }
 0x455   :  { %v473_v56 = vpack.c.bf16 %v470_v53, %v469_v52  ;;  %v474_v59 = vpack.c.bf16 %v472_v54, %v471_v55 }
 0x457   :  { %v481_v57 = vunpack.c.h.b16 %v473_v56  ;;  %v480_v58 = vunpack.c.l.b16 %v473_v56  ;;  %v549_v62 = vunpack.c.l.b16 %v474_v59  ;;  %v550_v63 = vunpack.c.h.b16 %v474_v59 }
 0x459   :  { %486 = vperm.xlu0 %759, %v481_v57   ;;  %483 = vperm.xlu1 %760, %v480_v58  }
 0x45d   :  { %632 = vperm.xlu0 %759, %v472_v54   ;;  %552 = vperm.xlu1 %760, %v549_v62  }
 0x461   :  { %555 = vperm.xlu1 %760, %v550_v63  }
 0x465   :  { %623 = vperm.xlu1 %760, %v469_v52  }
 0x469   :  { %626 = vperm.xlu1 %760, %v470_v53  }
 0x46d   :  { %629 = vperm.xlu1 %760, %v471_v55  }
 0x4d4   :  { %v487_v3 = vpop.permute.xlu0 %486  ;;  %v484_v4 = vpop.permute.xlu1 %483 }
 0x4d5   :  { %v495_v5 = vrot.slane %v487_v3, %v1000_v2  ;;  %v491_v48 = vrot.slane %v484_v4, %v997_v10 }
 0x4d7   :  { %v496_v7 = vsel %vm377_vm10, %v495_v5, %v491_v48 }
 0x4d8   :  { %v497_v9 = vpack.c.b16 %v496_v7, %v496_v7  ;;  %v553_v8 = vpop.permute.xlu1 %552  ;;  %v633_v18 = vpop.permute.xlu0 %632 }
 0x4d9   :  { %v560_v12 = vrot.slane %v553_v8, %v997_v10  ;;  %v650_v21 = vrot.slane %v633_v18, %v1000_v2 }
 0x4da   :  { %735 = vmatmul.mubr.msk.bf16.vlgmr.msra.gmra.mxu1 %vm504_vm14, %v497_v9 }
 0x4dc   :  { %v556_v11 = vpop.permute.xlu1 %555 }
 0x4dd   :  { %v564_v13 = vrot.slane %v556_v11, %v1000_v2 }
 0x4df   :  { %v565_v14 = vsel %vm377_vm10, %v564_v13, %v560_v12 }
 0x4e0   :  { %v566_v15 = vpack.c.b16 %v565_v14, %v565_v14  ;;  %v624_v16 = vpop.permute.xlu1 %623 }
 0x4e1   :  { %v637_v0 = vrot.slane %v624_v16, %v997_v10 }
 0x4e2   :  { %741 = vmatmul.mubr.msk.bf16.vlgmr.msra.gmra.mxu0 %vm504_vm14, %v566_v15 }
 0x4e4   :  { %v627_v17 = vpop.permute.xlu1 %626 }
 0x4e5   :  { %v641_v6 = vrot.slane %v627_v17, %v1000_v2 }
 0x4e7   :  { %v642_v19 = vsel %vm377_vm10, %v641_v6, %v637_v0 }
 0x4e8   :  { %655 = vst.msk [vmem:[#allocation4] sm:$0x1] %vm654_vm15, %v642_v19  ;;  %v630_v20 = vpop.permute.xlu1 %629 }
 0x4e9   :  { %v646_v22 = vrot.slane %v630_v20, %v997_v10 }
 0x4eb   :  { %v651_v23 = vsel %vm377_vm10, %v650_v21, %v646_v22 }
 0x4ec   :  { %656 = vst.msk [vmem:[#allocation4 + $0x1] sm:$0x1] %vm654_vm15, %v651_v23 }
 0x4ed   :  { %788 = shalt.err (!%p785_p4)
}
 0x4ee   :  { %s829_s17 = smov 16   ;;  %s830_s3 = smov 1  }
 0x4ef   :  { %680 = dma.vmem_to_hbm [thread:$0]  %s675_s15, 32, %s1052_s8, [#allocation5], %s829_s17, %s829_s17, %s830_s3  }
 0x4f0   :  { %s831_s20 = smov [#allocation2]  }
 0x4f1   :  { %s662_s21 = sshll.u32 %s831_s20, 4  ;;  %s663_s21 = int_to_ptr.vmem [resolvable:$true] %s662_s21 }
 0x4f2   :  { %s797_s22 = scalar_lea.vmem %s663_s21, 32  ;;  %p802_p6 = scmp.lt.s32.totalorder %s663_s21, %s663_s21 }
 0x4f3   :  { %p798_p5 = scmp.ne.s32.totalorder %s663_s21, %s797_s22  ;;  %p803_p7 = scmp.lt.s32.totalorder %s797_s22, %s797_s22 }
 0x4f5   :  { %p804_p8 = por %p803_p7, %p802_p6 }
 0x4f7   :  { %p805_p9 = pnand %p804_p8, %p798_p5 }
 0x59a   :  { %v542_v10 = vpop.f32.mrf.mxu1 }
 0x59b   :  { %616 = vst [vmem:[#allocation2] sm:$0x1] %v542_v10 }
 0x59c   :  { %v736_v2 = vpop.f32.mrf.mxu1 }
 0x59e   :  { %v545_v24 = vpop.f32.mrf.mxu1 }
 0x5a0   :  { %v737_v25 = vpop.f32.mrf.mxu1 }
 0x5a2   :  { %v610_v26 = vpop.f32.mrf.mxu0 }
 0x5a3   :  { %617 = vst [vmem:[#allocation2 + $0x1] sm:$0x1] %v610_v26 }
 0x5a4   :  { %v742_v27 = vpop.f32.mrf.mxu0 }
 0x5a5   :  { %808 = shalt.err (!%p805_p9)
}
 0x5a6   :  { %668 = dma.vmem_to_hbm [thread:$0]  %s663_s21, 32, %s1051_s7, [#allocation3], %s829_s17, %s829_s17, %s830_s3   ;;  %v613_v28 = vpop.f32.mrf.mxu0 }
 0x5a8   :  { %v743_v29 = vpop.f32.mrf.mxu0 }
 0x5a9   :  { %817 = dma.done.wait [#allocation3], 32  }
 0x5aa   :  { %818 = vsyncadd [#allocation3], 4294967264 }
 0x5ab   :  { %819 = dma.done.wait [#allocation5], 32  }
 0x5ac   :  { %820 = vsyncadd [#allocation5], 4294967264 }
 0x5ad   :  { %687 = vsyncpa [#allocation3], 1 }
 0x5ae   :  { %688 = vsyncpa [#allocation5], 1 }

</bundles_post_ra>
